<compile_context>
chip_gen: v5e
topology: v5e:2x2
jax: 0.10.0
libtpu: 0.0.40
codegen_flags: <defaults>
</compile_context>

<pallas_src>
import jax
import jax.numpy as jnp
from jax.experimental import pallas as pl
from jax.experimental.pallas import tpu as pltpu  # noqa: F401  (TPU backend)

SQRT_2_OVER_PI = 0.7978845608028654
GELU_C2 = SQRT_2_OVER_PI * 0.044715


def _conv1x1_gelu_kernel(x_ref, w_ref, b_ref, out_ref):
    """Fused 1x1 conv (VPU FMAs) + bias + tanh-GELU chain (v1..v10).

    x_ref  : (Cin,  M)       pre-strided, flattened input (batch == 1)
    w_ref  : (Cout, Cin)     1x1 conv weight
    b_ref  : (Cout, 1)       bias
    out_ref: (2, Cout, M)    stacked [v1; v10] output slab (single writeback)
    """
    Cin, _ = x_ref.shape

    # K = Cin (=3) contraction as unrolled VPU FMAs — no MXU, no K-padding.
    acc = w_ref[:, 0:1] * x_ref[0:1, :]
    for c in range(1, Cin):
        acc = acc + w_ref[:, c:c + 1] * x_ref[c:c + 1, :]
    v1 = acc + b_ref[...]                      # bias broadcast over spatial cols

    # tanh-GELU chain v2..v10, FMA-friendly form (1 EUP tanh, ~5 VALU ops).
    x2 = v1 * v1
    inner = v1 * (SQRT_2_OVER_PI + GELU_C2 * x2)
    v10 = (0.5 * v1) * (jnp.tanh(inner) + 1.0)

    out_ref[0] = v1.astype(out_ref.dtype)
    out_ref[1] = v10.astype(out_ref.dtype)


@jax.jit
def conv1_gelu(x, w, b):
    """conv1 (1x1, stride 2, no padding) + GELU(tanh approx) via one Pallas call.

    x: (1, C, H, W) float32 NCHW
    w: (Cout, C, 1, 1) float32
    b: (Cout,) float32
    Returns (v1, v10), each (1, Cout, OH, OW) NCHW.
    """
    N, C, H, W = x.shape
    Cout = w.shape[0]
    assert N == 1, "module input is batch-1"
    OH = (H - 1) // 2 + 1
    OW = (W - 1) // 2 + 1
    M = OH * OW

    # Tiny XLA strided-slice + metadata-only reshapes (effectively free).
    x_sub = x[0, :, ::2, ::2].reshape(C, M)
    w2 = w.reshape(Cout, C)
    b2 = b.reshape(Cout, 1)

    # No grid, full-extent default blocks: no software-pipeline prologue/epilogue.
    out = pl.pallas_call(
        _conv1x1_gelu_kernel,
        out_shape=jax.ShapeDtypeStruct((2, Cout, M), jnp.float32),
    )(x_sub, w2, b2)

    v1 = out[0].reshape(1, Cout, OH, OW)
    v10 = out[1].reshape(1, Cout, OH, OW)
    return v1, v10


if __name__ == "__main__":
    key = jax.random.PRNGKey(0)
    kx, kw, kb = jax.random.split(key, 3)

    # input shape from the module: x24 = torch.randn(1, 3, 4, 9)
    x = jax.random.normal(kx, (1, 3, 4, 9), dtype=jnp.float32)

    # deterministic conv1 parameters: Conv2d(3, 30, 1, stride=2, padding=0)
    w1 = jax.random.normal(kw, (30, 3, 1, 1), dtype=jnp.float32) / jnp.sqrt(3.0)
    b1 = jax.random.normal(kb, (30,), dtype=jnp.float32) * 0.1

    v1, v10 = conv1_gelu(x, w1, b1)
    jax.block_until_ready((v1, v10))

    # pure-JAX reference using the original op ordering of the PyTorch forward.
    v1_ref = (jnp.einsum("nchw,oc->nohw", x[:, :, ::2, ::2], w1.reshape(30, 3))
              + b1[None, :, None, None])
    v7_ref = (v1_ref + 0.044715 * v1_ref * v1_ref * v1_ref) * 0.7978845608028654
    v10_ref = (v1_ref * 0.5) * (jnp.tanh(v7_ref) + 1.0)

    assert v1.shape == (1, 30, 2, 5) and v10.shape == (1, 30, 2, 5)
    assert jnp.allclose(v1, v1_ref, atol=1e-5, rtol=1e-5)
    assert jnp.allclose(v10, v10_ref, atol=1e-5, rtol=1e-5)

    print("KERNEL_OK")
</pallas_src>

<mosaic_0001>
module attributes {stable_mosaic.version = 11 : i64} {
  func.func @_conv1x1_gelu_kernel(%arg0: memref<3x10xf32, #tpu.memory_space<vmem>>, %arg1: memref<30x3xf32, #tpu.memory_space<vmem>>, %arg2: memref<30x1xf32, #tpu.memory_space<vmem>>, %arg3: memref<2x30x10xf32, #tpu.memory_space<vmem>>) attributes {dimension_semantics = [], scalar_prefetch = 0 : i64, scratch_operands = 0 : i64, tpu.core_type = #tpu.core_type<tc>} {
    %c0 = arith.constant 0 : index
    %c0_0 = arith.constant 0 : index
    %0 = vector.load %arg1[%c0, %c0_0] : memref<30x3xf32, #tpu.memory_space<vmem>>, vector<30x1xf32>
    %c0_1 = arith.constant 0 : index
    %c0_2 = arith.constant 0 : index
    %1 = vector.load %arg0[%c0_1, %c0_2] : memref<3x10xf32, #tpu.memory_space<vmem>>, vector<1x10xf32>
    %2 = vector.broadcast %0 : vector<30x1xf32> to vector<30x10xf32>
    %3 = vector.broadcast %1 : vector<1x10xf32> to vector<30x10xf32>
    %4 = arith.mulf %2, %3 : vector<30x10xf32>
    %c0_3 = arith.constant 0 : index
    %c1 = arith.constant 1 : index
    %5 = vector.load %arg1[%c0_3, %c1] : memref<30x3xf32, #tpu.memory_space<vmem>>, vector<30x1xf32>
    %c1_4 = arith.constant 1 : index
    %c0_5 = arith.constant 0 : index
    %6 = vector.load %arg0[%c1_4, %c0_5] : memref<3x10xf32, #tpu.memory_space<vmem>>, vector<1x10xf32>
    %7 = vector.broadcast %5 : vector<30x1xf32> to vector<30x10xf32>
    %8 = vector.broadcast %6 : vector<1x10xf32> to vector<30x10xf32>
    %9 = arith.mulf %7, %8 : vector<30x10xf32>
    %10 = arith.addf %4, %9 : vector<30x10xf32>
    %c0_6 = arith.constant 0 : index
    %c2 = arith.constant 2 : index
    %11 = vector.load %arg1[%c0_6, %c2] : memref<30x3xf32, #tpu.memory_space<vmem>>, vector<30x1xf32>
    %c2_7 = arith.constant 2 : index
    %c0_8 = arith.constant 0 : index
    %12 = vector.load %arg0[%c2_7, %c0_8] : memref<3x10xf32, #tpu.memory_space<vmem>>, vector<1x10xf32>
    %13 = vector.broadcast %11 : vector<30x1xf32> to vector<30x10xf32>
    %14 = vector.broadcast %12 : vector<1x10xf32> to vector<30x10xf32>
    %15 = arith.mulf %13, %14 : vector<30x10xf32>
    %16 = arith.addf %10, %15 : vector<30x10xf32>
    %c0_9 = arith.constant 0 : index
    %c0_10 = arith.constant 0 : index
    %17 = vector.load %arg2[%c0_9, %c0_10] : memref<30x1xf32, #tpu.memory_space<vmem>>, vector<30x1xf32>
    %18 = vector.broadcast %17 : vector<30x1xf32> to vector<30x10xf32>
    %19 = arith.addf %16, %18 : vector<30x10xf32>
    %20 = arith.mulf %19, %19 : vector<30x10xf32>
    %cst = arith.constant 0.0356774069 : f32
    %21 = vector.broadcast %cst : f32 to vector<30x10xf32>
    %22 = arith.mulf %21, %20 : vector<30x10xf32>
    %cst_11 = arith.constant 0.797884583 : f32
    %23 = vector.broadcast %cst_11 : f32 to vector<30x10xf32>
    %24 = arith.addf %23, %22 : vector<30x10xf32>
    %25 = arith.mulf %19, %24 : vector<30x10xf32>
    %cst_12 = arith.constant 5.000000e-01 : f32
    %26 = vector.broadcast %cst_12 : f32 to vector<30x10xf32>
    %27 = arith.mulf %26, %19 : vector<30x10xf32>
    %28 = math.tanh %25 : vector<30x10xf32>
    %cst_13 = arith.constant 1.000000e+00 : f32
    %29 = vector.broadcast %cst_13 : f32 to vector<30x10xf32>
    %30 = arith.addf %28, %29 : vector<30x10xf32>
    %31 = arith.mulf %27, %30 : vector<30x10xf32>
    %c0_14 = arith.constant 0 : index
    %c0_15 = arith.constant 0 : index
    %c0_16 = arith.constant 0 : index
    %32 = vector.load %arg3[%c0_14, %c0_15, %c0_16] : memref<2x30x10xf32, #tpu.memory_space<vmem>>, vector<1x30x10xf32>
    %33 = vector.shape_cast %32 : vector<1x30x10xf32> to vector<30x10xf32>
    %34 = vector.shape_cast %19 : vector<30x10xf32> to vector<1x30x10xf32>
    tpu.vector_store %arg3[%c0_14, %c0_15, %c0_16], %34 {strides = array<i32>} : memref<2x30x10xf32, #tpu.memory_space<vmem>>, vector<1x30x10xf32>,
    %c1_17 = arith.constant 1 : index
    %c0_18 = arith.constant 0 : index
    %c0_19 = arith.constant 0 : index
    %35 = vector.load %arg3[%c1_17, %c0_18, %c0_19] : memref<2x30x10xf32, #tpu.memory_space<vmem>>, vector<1x30x10xf32>
    %36 = vector.shape_cast %35 : vector<1x30x10xf32> to vector<30x10xf32>
    %37 = vector.shape_cast %31 : vector<30x10xf32> to vector<1x30x10xf32>
    tpu.vector_store %arg3[%c1_17, %c0_18, %c0_19], %37 {strides = array<i32>} : memref<2x30x10xf32, #tpu.memory_space<vmem>>, vector<1x30x10xf32>,
    return
  }
}

</mosaic_0001>

<bundles_post_ra>
// kernel: squeeze.3
= control target key start
LH: loop header
LB: loop body
LE: loop exit
PB: predicated region body
PF: predicated region fallthrough
CT: control target
= control target key end

     0   :  { %vm15_vm0 = vcmask 39936   ;;  %vm21_vm1 = vcmask 80936   ;;  %s55_s0 = inlined_call_operand.vmem [shape: f32[1,3,2,5], index: 0, kind: input, shape index: {}]   ;;  %s56_s1 = inlined_call_operand.vmem [shape: f32[3,10], index: 1, kind: output, shape index: {}]  }
   0x1   :  { %v29_v0 = vld [vmem:[%s55_s0 + $0x4] sm:$0x3]  ;;  %v30_v1 = vld [vmem:[%s55_s0 + $0x2] sm:$0x3]  ;;  %v12_v2 = vld [vmem:[%s55_s0] sm:$0x3] }
   0x2   :  { %7 = vst [vmem:[#allocation1 + $0x10] sm:$0x3] %v29_v0  ;;  %s32_s0 = smov 5  }
   0x3   :  { %11 = vst [vmem:[#allocation1 + $0x8] sm:$0x3] %v30_v1 }
   0x4   :  { %13 = vst [vmem:[#allocation1] sm:$0x3] %v12_v2 }
   0xb   :  { %v18_v3 = vld [vmem:[#allocation1 + $0x1] ss:$8 sm:$0x7]   ;;  %v14_v4 = vld [vmem:[#allocation1] ss:$8 sm:$0x7]  }
   0xc   :  { %19 = vrot.lane.b32.xlu0 %v18_v3, %s32_s0  ;;  %16 = vst.msk [vmem:[#allocation0] sm:$0x7] %vm15_vm0, %v14_v4  }
  0x7e   :  { %v20_v5 = vpop.permute.xlu0 %19  }
  0x7f   :  { %22 = vst.msk [vmem:[#allocation0] sm:$0x7] %vm21_vm1, %v20_v5  }
  0x86   :  { %v25_v6 = vld [vmem:[#allocation0] sm:$0xf] }
  0x87   :  { %28 = vst [vmem:[%s56_s1] sm:$0xf] %v25_v6 }

// kernel: conv1_gelu.1
= control target key start
LH: loop header
LB: loop body
LE: loop exit
PB: predicated region body
PF: predicated region fallthrough
CT: control target
= control target key end

     0   :  { %v200_v0 = vmov 0   ;;  %v201_v3 = vmov 1   ;;  %v202_v6 = vmov 2   ;;  %vm156_vm0 = vcmask 80896   ;;  %s288_s1 = inlined_call_operand.vmem [shape: f32[30,3], index: 1, kind: input, shape index: {}]   ;;  %s289_s0 = inlined_call_operand.vmem [shape: f32[3,10], index: 0, kind: input, shape index: {}]   ;;  %s290_s2 = inlined_call_operand.vmem [shape: f32[30,1], index: 2, kind: input, shape index: {}]   ;;  %s291_s3 = inlined_call_operand.vmem [shape: f32[2,30,10], index: 3, kind: output, shape index: {}]  }
   0x1   :  { %179 = vset.pattern.permute.xlu1 %v200_v0  ;;  %178 = vset.pattern.permute.xlu0 %v200_v0  ;;  %v16_v1 = vld [vmem:[%s288_s1 + $0x10] sm:$0xff]  ;;  %v14_v2 = vld [vmem:[%s288_s1] sm:$0xff]  ;;  %v17_v4 = vld [vmem:[%s288_s1 + $0x18] sm:$0x3f]  ;;  %vm160_vm1 = vcmask 78848  }
   0x2   :  { %31 = vperm.xlu1 %179, %v16_v1   ;;  %21 = vperm.xlu0 %178, %v14_v2   ;;  %v15_v5 = vld [vmem:[%s288_s1 + $0x8] sm:$0xff]  ;;  %v96_v7 = vld [vmem:[%s290_s2] sm:$0xff]  ;;  %v98_v9 = vld [vmem:[%s290_s2 + $0x10] sm:$0xff] }
   0x3   :  { %180 = vset.pattern.permute.xlu2 %v201_v3  ;;  %v97_v8 = vld [vmem:[%s290_s2 + $0x8] sm:$0xff]  ;;  %v99_v10 = vld [vmem:[%s290_s2 + $0x18] sm:$0x3f]  ;;  %v189_v22 = vld [vmem:[%s289_s0 + $0x1] ss:$0 sm:$0xff] }
   0x4   :  { %46 = vperm.xlu2 %180, %v14_v2   ;;  %v190_v23 = vld [vmem:[%s289_s0] ss:$0 sm:$0xff]  ;;  %v191_v27 = vld [vmem:[%s289_s0 + $0x2] ss:$0 sm:$0xff] }
   0xa   :  { %36 = vperm.xlu1 %179, %v17_v4   ;;  %26 = vperm.xlu0 %178, %v15_v5  }
   0xc   :  { %50 = vperm.xlu2 %180, %v15_v5  }
  0x12   :  { %182 = vset.pattern.permute.xlu1 %v201_v3  ;;  %181 = vset.pattern.permute.xlu0 %v201_v3 }
  0x13   :  { %58 = vperm.xlu1 %182, %v17_v4   ;;  %54 = vperm.xlu0 %181, %v16_v1  }
  0x14   :  { %183 = vset.pattern.permute.xlu2 %v202_v6 }
  0x15   :  { %72 = vperm.xlu2 %183, %v14_v2  }
  0x1b   :  { %184 = vset.pattern.permute.xlu1 %v202_v6  ;;  %185 = vset.pattern.permute.xlu0 %v202_v6 }
  0x1c   :  { %76 = vperm.xlu1 %184, %v15_v5   ;;  %84 = vperm.xlu0 %185, %v17_v4  }
  0x1d   :  { %80 = vperm.xlu2 %183, %v16_v1  }
  0x24   :  { %186 = vset.pattern.permute.xlu1 %v200_v0  ;;  %188 = vset.pattern.permute.xlu0 %v200_v0 }
  0x25   :  { %102 = vperm.xlu1 %186, %v96_v7   ;;  %187 = vset.pattern.permute.xlu2 %v200_v0 }
  0x26   :  { %107 = vperm.xlu2 %187, %v97_v8  }
  0x2d   :  { %112 = vperm.xlu1 %186, %v98_v9  }
  0x2e   :  { %117 = vperm.xlu2 %187, %v99_v10  }
  0x5e   :  { %v47_v11 = vpop.permute.xlu2 %46 }
  0x5f   :  { %v62_v29 = vmul.f32 %v189_v22, %v47_v11 }
  0x66   :  { %v51_v12 = vpop.permute.xlu2 %50 }
  0x67   :  { %v63_v26 = vmul.f32 %v189_v22, %v51_v12 }
  0x6f   :  { %v73_v13 = vpop.permute.xlu2 %72 }
  0x70   :  { %v88_v41 = vmul.f32 %v191_v27, %v73_v13 }
  0x74   :  { %v32_v14 = vpop.permute.xlu1 %31  ;;  %v22_v15 = vpop.permute.xlu0 %21 }
  0x75   :  { %v40_v30 = vmul.f32 %v190_v23, %v22_v15  ;;  %v42_v51 = vmul.f32 %v190_v23, %v32_v14 }
  0x77   :  { %v81_v16 = vpop.permute.xlu2 %80  ;;  %v66_v40 = vadd.f32 %v62_v29, %v40_v30 }
  0x78   :  { %v90_v55 = vmul.f32 %v191_v27, %v81_v16 }
  0x79   :  { %v92_v47 = vadd.f32 %v88_v41, %v66_v40 }
  0x7c   :  { %v37_v17 = vpop.permute.xlu1 %36  ;;  %v27_v18 = vpop.permute.xlu0 %26 }
  0x7d   :  { %v41_v24 = vmul.f32 %v190_v23, %v27_v18  ;;  %v43_v28 = vmul.f32 %v190_v23, %v37_v17 }
  0x7f   :  { %v67_v33 = vadd.f32 %v63_v26, %v41_v24 }
  0x80   :  { %v108_v21 = vpop.permute.xlu2 %107 }
  0x85   :  { %v59_v19 = vpop.permute.xlu1 %58  ;;  %v55_v20 = vpop.permute.xlu0 %54 }
  0x86   :  { %v65_v25 = vmul.f32 %v189_v22, %v59_v19  ;;  %v64_v46 = vmul.f32 %v189_v22, %v55_v20 }
  0x88   :  { %v69_v34 = vadd.f32 %v65_v25, %v43_v28  ;;  %v118_v37 = vpop.permute.xlu2 %117  ;;  %v68_v56 = vadd.f32 %v64_v46, %v42_v51 }
  0x8a   :  { %v94_v62 = vadd.f32 %v90_v55, %v68_v56 }
  0x8e   :  { %v77_v31 = vpop.permute.xlu1 %76  ;;  %v85_v32 = vpop.permute.xlu0 %84 }
  0x8f   :  { %v89_v35 = vmul.f32 %v191_v27, %v77_v31  ;;  %v91_v36 = vmul.f32 %v191_v27, %v85_v32 }
  0x91   :  { %v93_v38 = vadd.f32 %v89_v35, %v67_v33  ;;  %v95_v39 = vadd.f32 %v91_v36, %v69_v34 }
  0x93   :  { %v121_v42 = vadd.f32 %v108_v21, %v93_v38  ;;  %v123_v43 = vadd.f32 %v118_v37, %v95_v39 }
  0x95   :  { %v125_v44 = vmul.f32 %v121_v42, %v121_v42  ;;  %158 = vst.msk [vmem:[%s291_s3 + $0x8] sm:$0xff] %vm156_vm0, %v121_v42  ;;  %v127_v45 = vmul.f32 %v123_v43, %v123_v43  ;;  %v141_v5 = vmul.f32 0.5, %v121_v42  ;;  %v143_v8 = vmul.f32 0.5, %v123_v43 }
  0x96   :  { %161 = vst.msk [vmem:[%s291_s3 + $0x18] sm:$0x3f] %vm160_vm1, %v123_v43 }
  0x97   :  { %v129_v48 = vmul.f32 0.035677407, %v125_v44  ;;  %v131_v49 = vmul.f32 0.035677407, %v127_v45  ;;  %v103_v50 = vpop.permute.xlu1 %102 }
  0x98   :  { %v120_v52 = vadd.f32 %v103_v50, %v92_v47 }
  0x99   :  { %v133_v53 = vadd.f32 0.7978846, %v129_v48  ;;  %v135_v54 = vadd.f32 0.7978846, %v131_v49 }
  0x9a   :  { %v124_v57 = vmul.f32 %v120_v52, %v120_v52  ;;  %157 = vst.msk [vmem:[%s291_s3] sm:$0xff] %vm156_vm0, %v120_v52  ;;  %v140_v15 = vmul.f32 0.5, %v120_v52 }
  0x9b   :  { %v137_v58 = vmul.f32 %v133_v53, %v121_v42  ;;  %v139_v59 = vmul.f32 %v135_v54, %v123_v43 }
  0x9c   :  { %v128_v60 = vmul.f32 0.035677407, %v124_v57 }
  0x9d   :  { %192 = vtanh.f32 %v137_v58 }
  0x9e   :  { %194 = vtanh.f32 %v139_v59  ;;  %v132_v61 = vadd.f32 0.7978846, %v128_v60 }
  0x9f   :  { %v113_v63 = vpop.permute.xlu1 %112 }
  0xa0   :  { %v136_v0 = vmul.f32 %v132_v61, %v120_v52  ;;  %v122_v1 = vadd.f32 %v113_v63, %v94_v62 }
  0xa2   :  { %196 = vtanh.f32 %v136_v0  ;;  %v126_v2 = vmul.f32 %v122_v1, %v122_v1  ;;  %159 = vst.msk [vmem:[%s291_s3 + $0x10] sm:$0xff] %vm156_vm0, %v122_v1  ;;  %v142_v19 = vmul.f32 0.5, %v122_v1 }
  0xa3   :  { %v193_v3 = vpop.eup %192 }
  0xa4   :  { %v195_v4 = vpop.eup %194  ;;  %v149_v6 = vadd.f32 1.0, %v193_v3  ;;  %v130_v7 = vmul.f32 0.035677407, %v126_v2 }
  0xa5   :  { %v151_v9 = vadd.f32 1.0, %v195_v4 }
  0xa6   :  { %v153_v10 = vmul.f32 %v149_v6, %v141_v5  ;;  %v134_v11 = vadd.f32 0.7978846, %v130_v7 }
  0xa7   :  { %v155_v12 = vmul.f32 %v151_v9, %v143_v8 }
  0xa8   :  { %v197_v13 = vpop.eup %196  ;;  %172 = vst.msk [vmem:[%s291_s3 + $0x28] sm:$0xff] %vm156_vm0, %v153_v10  ;;  %v138_v14 = vmul.f32 %v134_v11, %v122_v1 }
  0xa9   :  { %174 = vst.msk [vmem:[%s291_s3 + $0x38] sm:$0x3f] %vm160_vm1, %v155_v12  ;;  %v148_v16 = vadd.f32 1.0, %v197_v13 }
  0xaa   :  { %198 = vtanh.f32 %v138_v14 }
  0xab   :  { %v152_v17 = vmul.f32 %v148_v16, %v140_v15 }
  0xad   :  { %171 = vst.msk [vmem:[%s291_s3 + $0x20] sm:$0xff] %vm156_vm0, %v152_v17 }
  0xb0   :  { %v199_v18 = vpop.eup %198 }
  0xb1   :  { %v150_v20 = vadd.f32 1.0, %v199_v18 }
  0xb3   :  { %v154_v21 = vmul.f32 %v150_v20, %v142_v19 }
  0xb5   :  { %173 = vst.msk [vmem:[%s291_s3 + $0x30] sm:$0xff] %vm156_vm0, %v154_v21 }

</bundles_post_ra>
